<compile_context>
chip_gen: v6e
topology: v6e:2x2x1
jax: 0.10.0
libtpu: 0.0.40
codegen_flags: <defaults>
</compile_context>

<pallas_src>
import functools

import jax
import jax.numpy as jnp
from jax.experimental import pallas as pl
from jax.experimental.pallas import tpu as pltpu


def _round_up(x, m):
    return ((x + m - 1) // m) * m


def _mlp_kernel(n_inputs, n_linear, squeeze_out, *refs):
    """refs = (in_0..in_{n_inputs-1}, w0_0..w0_{n_inputs-1}, b0,
               w1, b1, ..., w_{L-1}, b_{L-1}, o_ref)."""
    o_ref = refs[-1]
    in_refs = refs[:n_inputs]
    w0_refs = refs[n_inputs:2 * n_inputs]
    b0_ref = refs[2 * n_inputs]
    tail = refs[2 * n_inputs + 1:-1]          # (w1, b1, w2, b2, ...)

    # Layer 0: fused concat via row-split first-layer weight. f32 accumulation.
    h = jnp.dot(in_refs[0][...], w0_refs[0][...],
                preferred_element_type=jnp.float32)
    for i in range(1, n_inputs):
        h = h + jnp.dot(in_refs[i][...], w0_refs[i][...],
                        preferred_element_type=jnp.float32)
    h = h + b0_ref[...].astype(jnp.float32)   # (1, h0) broadcasts over rows
    if n_linear > 1:
        h = jnp.maximum(h, 0.0)               # ReLU

    # Remaining linear layers.
    for l in range(n_linear - 1):
        w_ref = tail[2 * l]
        b_ref = tail[2 * l + 1]
        h = jnp.dot(h.astype(w_ref.dtype), w_ref[...],
                    preferred_element_type=jnp.float32)
        h = h + b_ref[...].astype(jnp.float32)
        if l < n_linear - 2:
            h = jnp.maximum(h, 0.0)

    if squeeze_out:
        h = jax.nn.sigmoid(h)
    o_ref[...] = h.astype(o_ref.dtype)


def rendering_network_forward(points, normals, view_dirs, feature_vectors,
                              params, *, mode="idr", squeeze_out=True,
                              tile_m=1024, compute_dtype=jnp.bfloat16):
    """params: list of (w (in,out) f32, b (out,) f32), weight-norm already folded."""
    # Concat ordering matches the PyTorch module exactly (but the concat itself
    # is fused into the kernel via row-split first-layer weights).
    if mode == "idr":
        inputs = [points, view_dirs, normals, feature_vectors]
    elif mode == "no_view_dir":
        inputs = [points, normals, feature_vectors]
    elif mode == "no_normal":
        inputs = [points, view_dirs, feature_vectors]
    else:
        raise ValueError(mode)

    n = inputs[0].shape[0]
    widths = [a.shape[1] for a in inputs]
    n_linear = len(params)
    d_out = params[-1][0].shape[1]

    # bf16 streaming inputs (in a real pipeline this cast fuses with the
    # upstream producer); f32 accumulation inside the kernel.
    if compute_dtype is not None:
        inputs = [a.astype(compute_dtype) for a in inputs]
    act_dtype = inputs[0].dtype
    sub = 8 if jnp.dtype(act_dtype).itemsize == 4 else 16   # sublane packing

    # Tile sizing: clamp to the (padded) row count, keep a multiple of the
    # sublane packing, and keep >= 2 grid steps when possible so both v7x
    # TensorCores get work under dimension_semantics=("parallel",).
    tile_m_eff = min(tile_m, _round_up(n, sub))
    if n >= 2 * sub:
        tile_m_eff = min(tile_m_eff, _round_up((n + 1) // 2, sub))
    tile_m_eff = max(sub, (tile_m_eff // sub) * sub)

    n_pad = _round_up(n, tile_m_eff)
    if n_pad != n:
        pad = n_pad - n
        inputs = [jnp.pad(a, ((0, pad), (0, 0))) for a in inputs]
    grid = (n_pad // tile_m_eff,)

    # --- build kernel operands + specs ---
    flat_args = []
    in_specs = []

    # Streaming activation inputs (row-tiled).
    for a in inputs:
        w_in = a.shape[1]
        flat_args.append(a)
        in_specs.append(pl.BlockSpec((tile_m_eff, w_in), lambda i: (i, 0)))

    def _param_spec(arr):
        # Full array resident in VMEM; constant index_map => no re-DMA per step.
        return pl.BlockSpec(arr.shape, lambda i: (0, 0))

    # Layer 0: split the first weight by input rows (fused concat).
    w0, b0 = params[0]
    w_dtype = compute_dtype if compute_dtype is not None else w0.dtype
    off = 0
    w0_splits = []
    for w_in in widths:
        w0_splits.append(w0[off:off + w_in, :].astype(w_dtype))
        off += w_in
    assert off == w0.shape[0], "first-layer weight rows must match concat width"
    for ws in w0_splits:
        flat_args.append(ws)
        in_specs.append(_param_spec(ws))
    b0_2d = b0.reshape(1, -1).astype(jnp.float32)
    flat_args.append(b0_2d)
    in_specs.append(_param_spec(b0_2d))

    # Remaining layers.
    for (w, b) in params[1:]:
        w_c = w.astype(w_dtype)
        b_2d = b.reshape(1, -1).astype(jnp.float32)
        flat_args += [w_c, b_2d]
        in_specs += [_param_spec(w_c), _param_spec(b_2d)]

    # Cost estimate: tiny-K matmuls, HBM-bound; helps XLA overlap upstream ops.
    dims_list = [sum(widths)] + [p[0].shape[1] for p in params]
    flops = 2 * n_pad * sum(dims_list[l] * dims_list[l + 1]
                            for l in range(n_linear))
    transcendentals = n_pad * d_out if squeeze_out else 0
    bytes_accessed = (sum(int(a.size) * a.dtype.itemsize for a in flat_args)
                      + n_pad * d_out * 4)
    cost = pl.CostEstimate(flops=flops, transcendentals=transcendentals,
                           bytes_accessed=bytes_accessed)

    kernel = functools.partial(_mlp_kernel, len(inputs), n_linear, squeeze_out)

    out = pl.pallas_call(
        kernel,
        out_shape=jax.ShapeDtypeStruct((n_pad, d_out), jnp.float32),
        grid_spec=pltpu.PrefetchScalarGridSpec(
            num_scalar_prefetch=0,
            grid=grid,
            in_specs=in_specs,
            out_specs=pl.BlockSpec((tile_m_eff, d_out), lambda i: (i, 0)),
        ),
        compiler_params=pltpu.CompilerParams(
            dimension_semantics=("parallel",)),
        cost_estimate=cost,
    )(*flat_args)

    return out[:n] if n_pad != n else out


def init_weightnorm_params(key, dims):
    """Deterministic synthetic params; weight_norm folded: w = g * v / ||v||_row."""
    params = []
    for l in range(len(dims) - 1):
        key, kv, kg, kb = jax.random.split(key, 4)
        fan_in, fan_out = dims[l], dims[l + 1]
        v = jax.random.normal(kv, (fan_out, fan_in), dtype=jnp.float32) * 0.2
        g = jax.random.uniform(kg, (fan_out,), dtype=jnp.float32,
                               minval=0.5, maxval=1.5)
        b = jax.random.normal(kb, (fan_out,), dtype=jnp.float32) * 0.01
        # nn.utils.weight_norm(dim=0): per-output-row norm over remaining dims.
        row_norm = jnp.sqrt(jnp.sum(v * v, axis=1, keepdims=True))
        w_eff = g[:, None] * v / row_norm            # (out, in)
        params.append((w_eff.T, b))                   # stored (in, out), (out,)
    return params


def _reference_forward(points, normals, view_dirs, feature_vectors, params,
                       mode="idr", squeeze_out=True):
    if mode == "idr":
        x = jnp.concatenate([points, view_dirs, normals, feature_vectors], axis=-1)
    elif mode == "no_view_dir":
        x = jnp.concatenate([points, normals, feature_vectors], axis=-1)
    else:
        x = jnp.concatenate([points, view_dirs, feature_vectors], axis=-1)
    for l, (w, b) in enumerate(params):
        x = x @ w + b
        if l < len(params) - 1:
            x = jnp.maximum(x, 0.0)
    if squeeze_out:
        x = jax.nn.sigmoid(x)
    return x


if __name__ == "__main__":
    # Small config: d_in=9, d_feature=32, d_hidden=64, n_layers=2, d_out=3
    d_in, d_feature, d_hidden, n_layers, d_out = 9, 32, 64, 2, 3
    dims = [d_in + d_feature] + [d_hidden] * n_layers + [d_out]   # [41, 64, 64, 3]
    N = 256   # small demo; tile_m=128 below -> 2 grid steps (both v7x TCs busy)

    key = jax.random.PRNGKey(0)
    key, kp, kn, kv, kf = jax.random.split(key, 5)
    points = jax.random.normal(kp, (N, 3), dtype=jnp.float32)
    normals = jax.random.normal(kn, (N, 3), dtype=jnp.float32)
    view_dirs = jax.random.normal(kv, (N, 3), dtype=jnp.float32)
    feature_vectors = jax.random.normal(kf, (N, d_feature), dtype=jnp.float32)

    params = init_weightnorm_params(key, dims)

    # TODO(synk): multires_view > 0 positional-encoding embedder not instantiated
    # (multires_view=0 in this config, matching embedview_fn=None).

    out = rendering_network_forward(points, normals, view_dirs, feature_vectors,
                                    params, mode="idr", squeeze_out=True,
                                    tile_m=128)
    out = jax.block_until_ready(out)

    ref = _reference_forward(points, normals, view_dirs, feature_vectors, params)
    assert out.shape == (N, d_out)
    # bf16 streaming inputs/weights (f32 accumulation) -> relaxed tolerance vs
    # the pure-f32 reference; outputs are post-sigmoid in [0, 1].
    assert jnp.allclose(out, ref, atol=2e-2, rtol=2e-2), "mismatch vs JAX reference"

    print("KERNEL_OK")
</pallas_src>

<mosaic_0001>
module attributes {stable_mosaic.version = 11 : i64} {
  func.func @_mlp_kernel(%arg0: i32, %arg1: memref<128x3xbf16, #tpu.memory_space<vmem>>, %arg2: memref<128x3xbf16, #tpu.memory_space<vmem>>, %arg3: memref<128x3xbf16, #tpu.memory_space<vmem>>, %arg4: memref<128x32xbf16, #tpu.memory_space<vmem>>, %arg5: memref<3x64xbf16, #tpu.memory_space<vmem>>, %arg6: memref<3x64xbf16, #tpu.memory_space<vmem>>, %arg7: memref<3x64xbf16, #tpu.memory_space<vmem>>, %arg8: memref<32x64xbf16, #tpu.memory_space<vmem>>, %arg9: memref<1x64xf32, #tpu.memory_space<vmem>>, %arg10: memref<64x64xbf16, #tpu.memory_space<vmem>>, %arg11: memref<1x64xf32, #tpu.memory_space<vmem>>, %arg12: memref<64x3xbf16, #tpu.memory_space<vmem>>, %arg13: memref<1x3xf32, #tpu.memory_space<vmem>>, %arg14: memref<128x3xf32, #tpu.memory_space<vmem>>) attributes {dimension_semantics = [#tpu.dimension_semantics<parallel>], iteration_bounds = array<i64: 2>, scalar_prefetch = 0 : i64, scratch_operands = 0 : i64, tpu.core_type = #tpu.core_type<tc>, window_params = [{transform_indices = @transform_0, window_bounds = array<i64: 128, 3>}, {transform_indices = @transform_1, window_bounds = array<i64: 128, 3>}, {transform_indices = @transform_2, window_bounds = array<i64: 128, 3>}, {transform_indices = @transform_3, window_bounds = array<i64: 128, 32>}, {pipeline_mode = #tpu.pipeline_mode<synchronous>, transform_indices = @transform_4, window_bounds = array<i64: 3, 64>}, {pipeline_mode = #tpu.pipeline_mode<synchronous>, transform_indices = @transform_5, window_bounds = array<i64: 3, 64>}, {pipeline_mode = #tpu.pipeline_mode<synchronous>, transform_indices = @transform_6, window_bounds = array<i64: 3, 64>}, {pipeline_mode = #tpu.pipeline_mode<synchronous>, transform_indices = @transform_7, window_bounds = array<i64: 32, 64>}, {pipeline_mode = #tpu.pipeline_mode<synchronous>, transform_indices = @transform_8, window_bounds = array<i64: 1, 64>}, {pipeline_mode = #tpu.pipeline_mode<synchronous>, transform_indices = @transform_9, window_bounds = array<i64: 64, 64>}, {pipeline_mode = #tpu.pipeline_mode<synchronous>, transform_indices = @transform_10, window_bounds = array<i64: 1, 64>}, {pipeline_mode = #tpu.pipeline_mode<synchronous>, transform_indices = @transform_11, window_bounds = array<i64: 64, 3>}, {pipeline_mode = #tpu.pipeline_mode<synchronous>, transform_indices = @transform_12, window_bounds = array<i64: 1, 3>}, {transform_indices = @transform_13, window_bounds = array<i64: 128, 3>}]} {
    %c0 = arith.constant 0 : index
    %c0_0 = arith.constant 0 : index
    %0 = vector.load %arg1[%c0, %c0_0] : memref<128x3xbf16, #tpu.memory_space<vmem>>, vector<128x3xbf16>
    %c0_1 = arith.constant 0 : index
    %c0_2 = arith.constant 0 : index
    %1 = vector.load %arg5[%c0_1, %c0_2] : memref<3x64xbf16, #tpu.memory_space<vmem>>, vector<3x64xbf16>
    %cst = arith.constant dense<0.000000e+00> : vector<128x64xf32>
    %2 = tpu.matmul %0, %1, %cst {dimension_numbers = #tpu.dot_dimension_numbers<[1], [0], [0], [1], [0, 0, 1, 1], [], []>} : vector<128x3xbf16>, vector<3x64xbf16>, vector<128x64xf32> -> vector<128x64xf32>
    %c0_3 = arith.constant 0 : index
    %c0_4 = arith.constant 0 : index
    %3 = vector.load %arg2[%c0_3, %c0_4] : memref<128x3xbf16, #tpu.memory_space<vmem>>, vector<128x3xbf16>
    %c0_5 = arith.constant 0 : index
    %c0_6 = arith.constant 0 : index
    %4 = vector.load %arg6[%c0_5, %c0_6] : memref<3x64xbf16, #tpu.memory_space<vmem>>, vector<3x64xbf16>
    %cst_7 = arith.constant dense<0.000000e+00> : vector<128x64xf32>
    %5 = tpu.matmul %3, %4, %cst_7 {dimension_numbers = #tpu.dot_dimension_numbers<[1], [0], [0], [1], [0, 0, 1, 1], [], []>} : vector<128x3xbf16>, vector<3x64xbf16>, vector<128x64xf32> -> vector<128x64xf32>
    %6 = arith.addf %2, %5 : vector<128x64xf32>
    %c0_8 = arith.constant 0 : index
    %c0_9 = arith.constant 0 : index
    %7 = vector.load %arg3[%c0_8, %c0_9] : memref<128x3xbf16, #tpu.memory_space<vmem>>, vector<128x3xbf16>
    %c0_10 = arith.constant 0 : index
    %c0_11 = arith.constant 0 : index
    %8 = vector.load %arg7[%c0_10, %c0_11] : memref<3x64xbf16, #tpu.memory_space<vmem>>, vector<3x64xbf16>
    %cst_12 = arith.constant dense<0.000000e+00> : vector<128x64xf32>
    %9 = tpu.matmul %7, %8, %cst_12 {dimension_numbers = #tpu.dot_dimension_numbers<[1], [0], [0], [1], [0, 0, 1, 1], [], []>} : vector<128x3xbf16>, vector<3x64xbf16>, vector<128x64xf32> -> vector<128x64xf32>
    %10 = arith.addf %6, %9 : vector<128x64xf32>
    %c0_13 = arith.constant 0 : index
    %c0_14 = arith.constant 0 : index
    %11 = vector.load %arg4[%c0_13, %c0_14] : memref<128x32xbf16, #tpu.memory_space<vmem>>, vector<128x32xbf16>
    %c0_15 = arith.constant 0 : index
    %c0_16 = arith.constant 0 : index
    %12 = vector.load %arg8[%c0_15, %c0_16] : memref<32x64xbf16, #tpu.memory_space<vmem>>, vector<32x64xbf16>
    %cst_17 = arith.constant dense<0.000000e+00> : vector<128x64xf32>
    %13 = tpu.matmul %11, %12, %cst_17 {dimension_numbers = #tpu.dot_dimension_numbers<[1], [0], [0], [1], [0, 0, 1, 1], [], []>} : vector<128x32xbf16>, vector<32x64xbf16>, vector<128x64xf32> -> vector<128x64xf32>
    %14 = arith.addf %10, %13 : vector<128x64xf32>
    %c0_18 = arith.constant 0 : index
    %c0_19 = arith.constant 0 : index
    %15 = vector.load %arg9[%c0_18, %c0_19] : memref<1x64xf32, #tpu.memory_space<vmem>>, vector<1x64xf32>
    %16 = vector.broadcast %15 : vector<1x64xf32> to vector<128x64xf32>
    %17 = arith.addf %14, %16 : vector<128x64xf32>
    %cst_20 = arith.constant 0.000000e+00 : f32
    %18 = vector.broadcast %cst_20 : f32 to vector<128x64xf32>
    %19 = arith.maximumf %17, %18 : vector<128x64xf32>
    %20 = arith.truncf %19 : vector<128x64xf32> to vector<128x64xbf16>
    %c0_21 = arith.constant 0 : index
    %c0_22 = arith.constant 0 : index
    %21 = vector.load %arg10[%c0_21, %c0_22] : memref<64x64xbf16, #tpu.memory_space<vmem>>, vector<64x64xbf16>
    %cst_23 = arith.constant dense<0.000000e+00> : vector<128x64xf32>
    %22 = tpu.matmul %20, %21, %cst_23 {dimension_numbers = #tpu.dot_dimension_numbers<[1], [0], [0], [1], [0, 0, 1, 1], [], []>} : vector<128x64xbf16>, vector<64x64xbf16>, vector<128x64xf32> -> vector<128x64xf32>
    %c0_24 = arith.constant 0 : index
    %c0_25 = arith.constant 0 : index
    %23 = vector.load %arg11[%c0_24, %c0_25] : memref<1x64xf32, #tpu.memory_space<vmem>>, vector<1x64xf32>
    %24 = vector.broadcast %23 : vector<1x64xf32> to vector<128x64xf32>
    %25 = arith.addf %22, %24 : vector<128x64xf32>
    %cst_26 = arith.constant 0.000000e+00 : f32
    %26 = vector.broadcast %cst_26 : f32 to vector<128x64xf32>
    %27 = arith.maximumf %25, %26 : vector<128x64xf32>
    %28 = arith.truncf %27 : vector<128x64xf32> to vector<128x64xbf16>
    %c0_27 = arith.constant 0 : index
    %c0_28 = arith.constant 0 : index
    %29 = vector.load %arg12[%c0_27, %c0_28] : memref<64x3xbf16, #tpu.memory_space<vmem>>, vector<64x3xbf16>
    %cst_29 = arith.constant dense<0.000000e+00> : vector<128x3xf32>
    %30 = tpu.matmul %28, %29, %cst_29 {dimension_numbers = #tpu.dot_dimension_numbers<[1], [0], [0], [1], [0, 0, 1, 1], [], []>} : vector<128x64xbf16>, vector<64x3xbf16>, vector<128x3xf32> -> vector<128x3xf32>
    %c0_30 = arith.constant 0 : index
    %c0_31 = arith.constant 0 : index
    %31 = vector.load %arg13[%c0_30, %c0_31] : memref<1x3xf32, #tpu.memory_space<vmem>>, vector<1x3xf32>
    %32 = vector.broadcast %31 : vector<1x3xf32> to vector<128x3xf32>
    %33 = arith.addf %30, %32 : vector<128x3xf32>
    %34 = arith.negf %33 : vector<128x3xf32>
    %35 = math.exp %34 : vector<128x3xf32>
    %cst_32 = arith.constant 1.000000e+00 : f32
    %36 = vector.broadcast %cst_32 : f32 to vector<128x3xf32>
    %37 = arith.addf %36, %35 : vector<128x3xf32>
    %38 = arith.divf %36, %37 : vector<128x3xf32>
    %c0_33 = arith.constant 0 : index
    %c0_34 = arith.constant 0 : index
    %39 = vector.load %arg14[%c0_33, %c0_34] : memref<128x3xf32, #tpu.memory_space<vmem>>, vector<128x3xf32>
    tpu.vector_store %arg14[%c0_33, %c0_34], %38 {strides = array<i32>} : memref<128x3xf32, #tpu.memory_space<vmem>>, vector<128x3xf32>,
    return
  }
  func.func @transform_0(%arg0: i32) -> (i32, i32) {
    %c0_i32 = arith.constant 0 : i32
    %c0_i32_0 = arith.constant 0 : i32
    return %arg0, %c0_i32 : i32, i32
  }
  func.func @transform_1(%arg0: i32) -> (i32, i32) {
    %c0_i32 = arith.constant 0 : i32
    %c0_i32_0 = arith.constant 0 : i32
    return %arg0, %c0_i32 : i32, i32
  }
  func.func @transform_2(%arg0: i32) -> (i32, i32) {
    %c0_i32 = arith.constant 0 : i32
    %c0_i32_0 = arith.constant 0 : i32
    return %arg0, %c0_i32 : i32, i32
  }
  func.func @transform_3(%arg0: i32) -> (i32, i32) {
    %c0_i32 = arith.constant 0 : i32
    %c0_i32_0 = arith.constant 0 : i32
    return %arg0, %c0_i32 : i32, i32
  }
  func.func @transform_4(%arg0: i32) -> (i32, i32) {
    %c0_i32 = arith.constant 0 : i32
    %c0_i32_0 = arith.constant 0 : i32
    %c0_i32_1 = arith.constant 0 : i32
    return %c0_i32, %c0_i32_0 : i32, i32
  }
  func.func @transform_5(%arg0: i32) -> (i32, i32) {
    %c0_i32 = arith.constant 0 : i32
    %c0_i32_0 = arith.constant 0 : i32
    %c0_i32_1 = arith.constant 0 : i32
    return %c0_i32, %c0_i32_0 : i32, i32
  }
  func.func @transform_6(%arg0: i32) -> (i32, i32) {
    %c0_i32 = arith.constant 0 : i32
    %c0_i32_0 = arith.constant 0 : i32
    %c0_i32_1 = arith.constant 0 : i32
    return %c0_i32, %c0_i32_0 : i32, i32
  }
  func.func @transform_7(%arg0: i32) -> (i32, i32) {
    %c0_i32 = arith.constant 0 : i32
    %c0_i32_0 = arith.constant 0 : i32
    %c0_i32_1 = arith.constant 0 : i32
    return %c0_i32, %c0_i32_0 : i32, i32
  }
  func.func @transform_8(%arg0: i32) -> (i32, i32) {
    %c0_i32 = arith.constant 0 : i32
    %c0_i32_0 = arith.constant 0 : i32
    %c0_i32_1 = arith.constant 0 : i32
    return %c0_i32, %c0_i32_0 : i32, i32
  }
  func.func @transform_9(%arg0: i32) -> (i32, i32) {
    %c0_i32 = arith.constant 0 : i32
    %c0_i32_0 = arith.constant 0 : i32
    %c0_i32_1 = arith.constant 0 : i32
    return %c0_i32, %c0_i32_0 : i32, i32
  }
  func.func @transform_10(%arg0: i32) -> (i32, i32) {
    %c0_i32 = arith.constant 0 : i32
    %c0_i32_0 = arith.constant 0 : i32
    %c0_i32_1 = arith.constant 0 : i32
    return %c0_i32, %c0_i32_0 : i32, i32
  }
  func.func @transform_11(%arg0: i32) -> (i32, i32) {
    %c0_i32 = arith.constant 0 : i32
    %c0_i32_0 = arith.constant 0 : i32
    %c0_i32_1 = arith.constant 0 : i32
    return %c0_i32, %c0_i32_0 : i32, i32
  }
  func.func @transform_12(%arg0: i32) -> (i32, i32) {
    %c0_i32 = arith.constant 0 : i32
    %c0_i32_0 = arith.constant 0 : i32
    %c0_i32_1 = arith.constant 0 : i32
    return %c0_i32, %c0_i32_0 : i32, i32
  }
  func.func @transform_13(%arg0: i32) -> (i32, i32) {
    %c0_i32 = arith.constant 0 : i32
    %c0_i32_0 = arith.constant 0 : i32
    return %arg0, %c0_i32 : i32, i32
  }
}

</mosaic_0001>

<bundles_post_ra>
// kernel: tpu_custom_call.1
= control target key start
LH: loop header
LB: loop body
LE: loop exit
PB: predicated region body
PF: predicated region fallthrough
CT: control target
= control target key end

     0   :  { %s2384_s25 = smov 0   ;;  %s2674_s0 = inlined_call_operand.vmem [shape: bf16[256,3], index: 0, kind: input, shape index: {}]   ;;  %s2675_s1 = inlined_call_operand.vmem [shape: bf16[256,3], index: 1, kind: input, shape index: {}]   ;;  %s2676_s2 = inlined_call_operand.vmem [shape: bf16[256,3], index: 2, kind: input, shape index: {}]   ;;  %s2677_s3 = inlined_call_operand.vmem [shape: bf16[256,32], index: 3, kind: input, shape index: {}]   ;;  %s2678_s4 = inlined_call_operand.vmem [shape: bf16[3,64], index: 4, kind: input, shape index: {}]   ;;  %s2679_s5 = inlined_call_operand.vmem [shape: bf16[3,64], index: 5, kind: input, shape index: {}]   ;;  %s2680_s6 = inlined_call_operand.vmem [shape: bf16[3,64], index: 6, kind: input, shape index: {}]   ;;  %s2681_s7 = inlined_call_operand.vmem [shape: bf16[32,64], index: 7, kind: input, shape index: {}]   ;;  %s2682_s8 = inlined_call_operand.vmem [shape: f32[1,64], index: 8, kind: input, shape index: {}]   ;;  %s2683_s9 = inlined_call_operand.vmem [shape: bf16[64,64], index: 9, kind: input, shape index: {}]   ;;  %s2684_s10 = inlined_call_operand.vmem [shape: f32[1,64], index: 10, kind: input, shape index: {}]   ;;  %s2685_s11 = inlined_call_operand.vmem [shape: bf16[64,3], index: 11, kind: input, shape index: {}]   ;;  %s2686_s12 = inlined_call_operand.vmem [shape: f32[1,3], index: 12, kind: input, shape index: {}]   ;;  %s2687_s13 = inlined_call_operand.vmem [shape: f32[256,3], index: 13, kind: output, shape index: {}]  }
   0x1 LB: > { %s1881_s26 = sadd.s32 4294967295, %s2311_s25   ;;  %p1885_p0 = scmp.ge.s32.totalorder %s2311_s25, 1  ;;  %s2311_s25 = sphi %s2384_s25, %s23_s25  }
   0x2   : > { %p421_p1 = scmp.lt.s32.totalorder %s2311_s25, 3 }
   0x4   : > { %p422_p2 = pnand %p1885_p0, %p421_p1 }
   0x5   : > { %s1886_s29 = sshll.u32 (!%p422_p2), %s1881_s26, 4 }
   0x6   : > { %425 = sbr.rel (%p422_p2) target bundleno = 727 (0x2d7), region = 72  ;;  %p481_p3 = scmp.lt.s32.totalorder (!%p422_p2), %s1886_s29, 31 }
   0xb   : > { %v544_v0 = vld [vmem:[%s2679_s5] sm:$0x3]  ;;  %vm610_vm0 = vcmask 1040384   ;;  %vm611_vm1 = vcmask 1041408   ;;  %v2313_v1 = vmov 65535   ;;  %s2689_s29 = smov (!%p481_p3, %s1886_s29), 31 }
   0xc   : > { %v612_v2 = vsel %vm610_vm0, 4294967295, %v2313_v1  ;;  %v527_v3 = vld [vmem:[%s2678_s4] sm:$0x3]  ;;  %v2203_v9 = vld [vmem:[%s2681_s7 + $0x8] sm:$0xff]   ;;  %s2407_s19 = sshll.u32 %s2689_s29, 2  ;;  %vm585_vm2 = vcmask 23552  }
   0xd   : > { %v613_v4 = vsel %vm611_vm1, %v612_v2, 0  ;;  %v894_v5 = vld [vmem:[%s2680_s6] sm:$0x3]  ;;  %s2413_s22 = scalar_lea.vmem %s2675_s1, %s2407_s19  ;;  %s2420_s26 = scalar_lea.vmem %s2674_s0, %s2407_s19  ;;  %vm1147_vm3 = vcmask 261120   ;;  %v2233_v43 = vld [vmem:[%s2683_s9 + $0x18] sm:$0xff]   ;;  %v2234_v44 = vld [vmem:[%s2683_s9 + $0x10] sm:$0xff]  }
   0xe   : > { %v615_v6 = vand.u32 %v613_v4, %v544_v0  ;;  %v779_v7 = vand.u32 %v613_v4, %v527_v3  ;;  %v960_v8 = vand.u32 %v894_v5, %v613_v4  ;;  %v2199_v10 = vld [vmem:[%s2413_s22] sm:$0xff]   ;;  %v2201_v13 = vld [vmem:[%s2413_s22 + $0x8] sm:$0xff]   ;;  %v2204_v15 = vld [vmem:[%s2413_s22 + $0x10] sm:$0xff]   ;;  %s2449_s15 = scalar_lea.vmem %s2676_s2, %s2407_s19  ;;  %s2456_s18 = scalar_lea.vmem %s2677_s3, %s2407_s19  ;;  %vm1371_vm4 = vcmask 523264  }
   0xf   : > { %v2200_v11 = vld [vmem:[%s2420_s26] sm:$0xff]   ;;  %2070 = vmatprep.mubr.msk.bf16.mxu0 %vm585_vm2, %v2199_v10  ;;  %v2202_v14 = vld [vmem:[%s2420_s26 + $0x8] sm:$0xff]   ;;  %v2205_v16 = vld [vmem:[%s2420_s26 + $0x10] sm:$0xff]   ;;  %s1895_s27 = sshll.u32 %s2689_s29, 3 }
  0x10   : > { %2068 = vmatprep.subr.bf16.mxu0 %v615_v6  ;;  %2086 = vmatprep.subr.bf16.mxu1 %v779_v7  ;;  %v2212_v12 = vld [vmem:[%s2681_s7] sm:$0xff]   ;;  %v2206_v17 = vld [vmem:[%s2413_s22 + $0x18] sm:$0xff]   ;;  %v2210_v21 = vld [vmem:[%s2413_s22 + $0x28] sm:$0xff]   ;;  %s2636_s14 = scalar_lea.vmem %s2687_s13, %s1895_s27 }
  0x11   : > { %2069 = vmatpush3.bf16.msra.mxu0 %v615_v6  ;;  %2087 = vmatpush3.bf16.msra.mxu1 %v779_v7  ;;  %v2207_v18 = vld [vmem:[%s2420_s26 + $0x18] sm:$0xff]   ;;  %v2208_v19 = vld [vmem:[%s2413_s22 + $0x20] sm:$0xff]   ;;  %v2211_v22 = vld [vmem:[%s2420_s26 + $0x28] sm:$0xff]  }
  0x12   : > { %2104 = vmatprep.subr.bf16.mxu0 %v960_v8  ;;  %2122 = vmatprep.subr.bf16.mxu1 %v2203_v9  ;;  %v2209_v20 = vld [vmem:[%s2420_s26 + $0x20] sm:$0xff]   ;;  %v2213_v23 = vld [vmem:[%s2413_s22 + $0x30] sm:$0xff]   ;;  %v2215_v25 = vld [vmem:[%s2413_s22 + $0x38] sm:$0xff]  }
  0x13   : > { %2088 = vmatprep.mubr.msk.bf16.mxu1 %vm585_vm2, %v2200_v11  ;;  %v2214_v24 = vld [vmem:[%s2420_s26 + $0x30] sm:$0xff]   ;;  %v2216_v26 = vld [vmem:[%s2420_s26 + $0x38] sm:$0xff]   ;;  %v2217_v27 = vld [vmem:[%s2449_s15] sm:$0xff]  }
  0x14   : > { %2071 = vmatmul.mubr.msk.bf16.vlgmr.msra.gmra.mxu0 %vm585_vm2, %v2201_v13  ;;  %2089 = vmatmul.mubr.msk.bf16.vlgmr.msra.gmra.mxu1 %vm585_vm2, %v2202_v14  ;;  %v2218_v28 = vld [vmem:[%s2456_s18] sm:$0xff]   ;;  %v2219_v29 = vld [vmem:[%s2449_s15 + $0x8] sm:$0xff]   ;;  %v2221_v31 = vld [vmem:[%s2449_s15 + $0x10] sm:$0xff]  }
  0x15   : > { %2105 = vmatpush3.bf16.msra.mxu0 %v960_v8  ;;  %2123 = vmatpush3.bf16.msra.mxu1 %v2203_v9  ;;  %v2220_v30 = vld [vmem:[%s2456_s18 + $0x8] sm:$0xff]   ;;  %v2222_v32 = vld [vmem:[%s2456_s18 + $0x10] sm:$0xff]   ;;  %v2223_v33 = vld [vmem:[%s2449_s15 + $0x18] sm:$0xff]  }
  0x16   : > { %2074 = vmatprep.mubr.msk.bf16.mxu0 %vm585_vm2, %v2204_v15  ;;  %2092 = vmatprep.mubr.msk.bf16.mxu1 %vm585_vm2, %v2205_v16  ;;  %v2224_v34 = vld [vmem:[%s2456_s18 + $0x18] sm:$0xff]   ;;  %v2225_v35 = vld [vmem:[%s2449_s15 + $0x20] sm:$0xff]   ;;  %v2227_v37 = vld [vmem:[%s2449_s15 + $0x28] sm:$0xff]  }
  0x17   : > { %2124 = vmatprep.subr.bf16.mxu1 %v2212_v12  ;;  %v2226_v36 = vld [vmem:[%s2456_s18 + $0x20] sm:$0xff]   ;;  %v2228_v38 = vld [vmem:[%s2456_s18 + $0x28] sm:$0xff]   ;;  %v2229_v39 = vld [vmem:[%s2449_s15 + $0x30] sm:$0xff]   ;;  %2142 = vmatprep.subr.bf16.mxu0 %v2233_v43 }
  0x18   : > { %v2230_v40 = vld [vmem:[%s2456_s18 + $0x30] sm:$0xff]   ;;  %v2231_v41 = vld [vmem:[%s2449_s15 + $0x38] sm:$0xff]   ;;  %v2235_v45 = vld [vmem:[%s2683_s9 + $0x8] sm:$0xff]  }
  0x19   : > { %2125 = vmatpush3.bf16.msra.mxu1 %v2212_v12  ;;  %v2232_v42 = vld [vmem:[%s2456_s18 + $0x38] sm:$0xff]   ;;  %v2236_v46 = vld [vmem:[%s2683_s9] sm:$0xff]   ;;  %v2238_v48 = vld [vmem:[%s2685_s11 + $0x10] sm:$0xff]  }
  0x1a   : > { %v2237_v47 = vld [vmem:[%s2685_s11 + $0x18] sm:$0xff]   ;;  %v2239_v49 = vld [vmem:[%s2685_s11 + $0x8] sm:$0xff]  }
  0x1b   : > { %2166 = vmatprep.subr.bf16.mxu1 %v2237_v47 }
  0x1c   : > { %2075 = vmatmul.mubr.msk.bf16.gmra.mxu0 %vm585_vm2, %v2206_v17  ;;  %2093 = vmatmul.mubr.msk.bf16.gmra.mxu1 %vm585_vm2, %v2207_v18 }
  0x1d   : > { %2078 = vmatprep.mubr.msk.bf16.mxu0 %vm585_vm2, %v2208_v19  ;;  %2096 = vmatprep.mubr.msk.bf16.mxu1 %vm585_vm2, %v2209_v20 }
  0x24   : > { %2079 = vmatmul.mubr.msk.bf16.gmra.mxu0 %vm585_vm2, %v2210_v21  ;;  %2097 = vmatmul.mubr.msk.bf16.gmra.mxu1 %vm585_vm2, %v2211_v22 }
  0x25   : > { %2082 = vmatprep.mubr.msk.bf16.mxu0 %vm585_vm2, %v2213_v23  ;;  %2100 = vmatprep.mubr.msk.bf16.mxu1 %vm585_vm2, %v2214_v24 }
  0x2c   : > { %2083 = vmatmul.mubr.msk.bf16.gmra.mxu0 %vm585_vm2, %v2215_v25  ;;  %2101 = vmatmul.mubr.msk.bf16.gmra.mxu1 %vm585_vm2, %v2216_v26 }
  0x2d   : > { %2106 = vmatprep.mubr.msk.bf16.mxu0 %vm585_vm2, %v2217_v27  ;;  %2126 = vmatprep.mubr.msk.bf16.mxu1 %vm1147_vm3, %v2218_v28 }
  0x34   : > { %2107 = vmatmul.mubr.msk.bf16.vlgmr.msra.gmra.mxu0 %vm585_vm2, %v2219_v29  ;;  %2127 = vmatmul.mubr.msk.bf16.vlgmr.msra.gmra.mxu1 %vm1147_vm3, %v2220_v30 }
  0x35   : > { %2110 = vmatprep.mubr.msk.bf16.mxu0 %vm585_vm2, %v2221_v31  ;;  %2130 = vmatprep.mubr.msk.bf16.mxu1 %vm1147_vm3, %v2222_v32 }
  0x36   : > { %2143 = vmatpush3.bf16.msra.mxu0 %v2233_v43  ;;  %2167 = vmatpush3.bf16.msra.mxu1 %v2237_v47 }
  0x37   : > { %2144 = vmatprep.subr.bf16.mxu0 %v2234_v44  ;;  %2168 = vmatprep.subr.bf16.mxu1 %v2238_v48 }
  0x3a   : > { %2145 = vmatpush3.bf16.msra.mxu0 %v2234_v44  ;;  %2169 = vmatpush3.bf16.msra.mxu1 %v2238_v48 }
  0x3b   : > { %2146 = vmatprep.subr.bf16.mxu0 %v2235_v45  ;;  %2170 = vmatprep.subr.bf16.mxu1 %v2239_v49 }
  0x3c   : > { %2111 = vmatmul.mubr.msk.bf16.gmra.mxu0 %vm585_vm2, %v2223_v33  ;;  %2131 = vmatmul.mubr.msk.bf16.gmra.mxu1 %vm1147_vm3, %v2224_v34  ;;  %v2556_v34 = vld [vmem:[%s2682_s8] ss:$0 sm:$0xff] }
  0x3d   : > { %2114 = vmatprep.mubr.msk.bf16.mxu0 %vm585_vm2, %v2225_v35  ;;  %2134 = vmatprep.mubr.msk.bf16.mxu1 %vm1147_vm3, %v2226_v36 }
  0x3e   : > { %2147 = vmatpush3.bf16.msra.mxu0 %v2235_v45  ;;  %2171 = vmatpush3.bf16.msra.mxu1 %v2239_v49 }
  0x3f   : > { %2148 = vmatprep.subr.bf16.mxu0 %v2236_v46 }
  0x42   : > { %2149 = vmatpush3.bf16.msra.mxu0 %v2236_v46 }
  0x44   : > { %2115 = vmatmul.mubr.msk.bf16.gmra.mxu0 %vm585_vm2, %v2227_v37  ;;  %2135 = vmatmul.mubr.msk.bf16.gmra.mxu1 %vm1147_vm3, %v2228_v38 }
  0x45   : > { %2118 = vmatprep.mubr.msk.bf16.mxu0 %vm585_vm2, %v2229_v39  ;;  %2138 = vmatprep.mubr.msk.bf16.mxu1 %vm1147_vm3, %v2230_v40 }
  0x4c   : > { %2119 = vmatmul.mubr.msk.bf16.gmra.mxu0 %vm585_vm2, %v2231_v41  ;;  %2139 = vmatmul.mubr.msk.bf16.gmra.mxu1 %vm1147_vm3, %v2232_v42 }
  0xd4   : > { %v2072_v50 = vpop.f32.mrf.mxu0  ;;  %v2090_v51 = vpop.f32.mrf.mxu1 }
  0xd5   : > { %v824_v18 = vadd.f32 %v2090_v51, %v2072_v50 }
  0xd6   : > { %v651_v52 = vpop.f32.mrf.mxu0  ;;  %v815_v53 = vpop.f32.mrf.mxu1 }
  0xd7   : > { %v816_v20 = vadd.f32 %v815_v53, %v651_v52 }
  0xd8   : > { %v2073_v54 = vpop.f32.mrf.mxu0  ;;  %v2091_v55 = vpop.f32.mrf.mxu1 }
  0xd9   : > { %v827_v24 = vadd.f32 %v2091_v55, %v2073_v54 }
  0xda   : > { %v654_v56 = vpop.f32.mrf.mxu0  ;;  %v818_v57 = vpop.f32.mrf.mxu1 }
  0xdb   : > { %v819_v28 = vadd.f32 %v818_v57, %v654_v56 }
  0xdc   : > { %v2076_v58 = vpop.f32.mrf.mxu0  ;;  %v2094_v59 = vpop.f32.mrf.mxu1 }
  0xdd   : > { %v840_v38 = vadd.f32 %v2094_v59, %v2076_v58 }
  0xde   : > { %v667_v60 = vpop.f32.mrf.mxu0  ;;  %v831_v61 = vpop.f32.mrf.mxu1 }
  0xdf   : > { %v832_v40 = vadd.f32 %v831_v61, %v667_v60 }
  0xe0   : > { %v2077_v62 = vpop.f32.mrf.mxu0  ;;  %v2095_v63 = vpop.f32.mrf.mxu1 }
  0xe1   : > { %v843_v51 = vadd.f32 %v2095_v63, %v2077_v62 }
  0xe2   : > { %v670_v0 = vpop.f32.mrf.mxu0  ;;  %v834_v1 = vpop.f32.mrf.mxu1 }
  0xe3   : > { %v835_v54 = vadd.f32 %v834_v1, %v670_v0 }
  0xe4   : > { %v2521_v2 = vpop.f32.mrf.mxu0  ;;  %v2523_v3 = vpop.f32.mrf.mxu1 }
  0xe5   : > { %v856_v62 = vadd.f32 %v2523_v3, %v2521_v2 }
  0xe6   : > { %v2525_v4 = vpop.f32.mrf.mxu0  ;;  %v2527_v5 = vpop.f32.mrf.mxu1 }
  0xe7   : > { %v848_v63 = vadd.f32 %v2527_v5, %v2525_v4 }
  0xe8   : > { %v2529_v6 = vpop.f32.mrf.mxu0  ;;  %v2531_v7 = vpop.f32.mrf.mxu1 }
  0xea   : > { %v2533_v8 = vpop.f32.mrf.mxu0  ;;  %v2535_v9 = vpop.f32.mrf.mxu1 }
  0xec   : > { %v2537_v10 = vpop.f32.mrf.mxu0  ;;  %v2539_v11 = vpop.f32.mrf.mxu1 }
  0xee   : > { %v2541_v12 = vpop.f32.mrf.mxu0  ;;  %v2543_v13 = vpop.f32.mrf.mxu1 }
  0xf0   : > { %v2545_v14 = vpop.f32.mrf.mxu0  ;;  %v2547_v15 = vpop.f32.mrf.mxu1 }
  0xf2   : > { %v2549_v16 = vpop.f32.mrf.mxu0  ;;  %v2551_v17 = vpop.f32.mrf.mxu1 }
  0xf4   : > { %v2108_v19 = vpop.f32.mrf.mxu0  ;;  %v2128_v21 = vpop.f32.mrf.mxu1 }
  0xf5   : > { %v1061_v22 = vadd.f32 %v2108_v19, %v824_v18 }
  0xf6   : > { %v996_v23 = vpop.f32.mrf.mxu0  ;;  %v1206_v26 = vpop.f32.mrf.mxu1 }
  0xf7   : > { %v1059_v25 = vadd.f32 %v996_v23, %v816_v20  ;;  %v1271_v32 = vadd.f32 %v2128_v21, %v1061_v22 }
  0xf8   : > { %v2109_v27 = vpop.f32.mrf.mxu0  ;;  %v2129_v31 = vpop.f32.mrf.mxu1 }
  0xf9   : > { %v1269_v29 = vadd.f32 %v1206_v26, %v1059_v25  ;;  %v1062_v30 = vadd.f32 %v2109_v27, %v827_v24  ;;  %v1294_v45 = vadd.f32 %v2556_v34, %v1271_v32 }
  0xfa   : > { %v999_v33 = vpop.f32.mrf.mxu0  ;;  %v1209_v37 = vpop.f32.mrf.mxu1 }
  0xfb   : > { %v1272_v35 = vadd.f32 %v2129_v31, %v1062_v30  ;;  %v1060_v36 = vadd.f32 %v999_v33, %v819_v28  ;;  %v1292_v41 = vadd.f32 %v2556_v34, %v1269_v29  ;;  %v1310_v59 = vmax.f32 %v1294_v45, 0.0 }
  0xfc   : > { %v2112_v39 = vpop.f32.mrf.mxu0  ;;  %v2132_v44 = vpop.f32.mrf.mxu1  ;;  %v859_v29 = vadd.f32 %v2531_v7, %v2529_v6 }
  0xfd   : > { %v1295_v42 = vadd.f32 %v2556_v34, %v1272_v35  ;;  %v1270_v43 = vadd.f32 %v1209_v37, %v1060_v36  ;;  %v1065_v46 = vadd.f32 %v2112_v39, %v840_v38  ;;  %v1308_v55 = vmax.f32 %v1292_v41, 0.0 }
  0xfe   : > { %v1012_v47 = vpop.f32.mrf.mxu0  ;;  %v1222_v50 = vpop.f32.mrf.mxu1  ;;  %v851_v37 = vadd.f32 %v2535_v9, %v2533_v8 }
  0xff   : > { %v1293_v48 = vadd.f32 %v2556_v34, %v1270_v43  ;;  %v1063_v49 = vadd.f32 %v1012_v47, %v832_v40  ;;  %v1311_v52 = vmax.f32 %v1295_v42, 0.0  ;;  %v1275_v60 = vadd.f32 %v2132_v44, %v1065_v46 }
 0x100   : > { %v2113_v53 = vpop.f32.mrf.mxu0  ;;  %v2133_v58 = vpop.f32.mrf.mxu1  ;;  %v872_v46 = vadd.f32 %v2539_v11, %v2537_v10  ;;  %v864_v47 = vadd.f32 %v2543_v13, %v2541_v12 }
 0x101   : > { %v1309_v56 = vmax.f32 %v1293_v48, 0.0  ;;  %v1273_v57 = vadd.f32 %v1222_v50, %v1063_v49  ;;  %v1066_v61 = vadd.f32 %v2113_v53, %v843_v51  ;;  %v1325_v22 = vpack.c.bf16 %v1311_v52, %v1310_v59 }
 0x102   : > { %v1015_v18 = vpop.f32.mrf.mxu0  ;;  %v1225_v21 = vpop.f32.mrf.mxu1  ;;  %v1298_v26 = vadd.f32 %v2556_v34, %v1275_v60  ;;  %v875_v51 = vadd.f32 %v2547_v15, %v2545_v14 }
 0x103   : > { %v1324_v19 = vpack.c.bf16 %v1309_v56, %v1308_v55  ;;  %v1064_v20 = vadd.f32 %v1015_v18, %v835_v54  ;;  %v1276_v23 = vadd.f32 %v2133_v58, %v1066_v61  ;;  %v1296_v0 = vadd.f32 %v2556_v34, %v1273_v57 }
 0x104   : > { %v2116_v24 = vpop.f32.mrf.mxu0  ;;  %v2136_v25 = vpop.f32.mrf.mxu1  ;;  %v1314_v38 = vmax.f32 %v1298_v26, 0.0  ;;  %v867_v54 = vadd.f32 %v2551_v17, %v2549_v16 }
 0x105   : > { %v1274_v1 = vadd.f32 %v1225_v21, %v1064_v20  ;;  %2150 = vmatprep.mubr.msk.bf16.mxu0 %vm1371_vm4, %v1324_v19  ;;  %v1299_v27 = vadd.f32 %v2556_v34, %v1276_v23  ;;  %v1069_v3 = vadd.f32 %v2116_v24, %v856_v62  ;;  %v1312_v32 = vmax.f32 %v1296_v0, 0.0 }
 0x106   : > { %v1028_v28 = vpop.f32.mrf.mxu0  ;;  %2151 = vmatmul.mubr.msk.bf16.vlgmr.msra.gmra.mxu0 %vm1371_vm4, %v1325_v22  ;;  %v1238_v5 = vpop.f32.mrf.mxu1 }
 0x107   : > { %v1297_v2 = vadd.f32 %v2556_v34, %v1274_v1  ;;  %v1067_v4 = vadd.f32 %v1028_v28, %v848_v63  ;;  %v1315_v30 = vmax.f32 %v1299_v27, 0.0  ;;  %v1279_v42 = vadd.f32 %v2136_v25, %v1069_v3  ;;  %v2240_v28 = vld [vmem:[%s2685_s11] sm:$0xff]  }
 0x108   : > { %v2117_v31 = vpop.f32.mrf.mxu0  ;;  %v2137_v36 = vpop.f32.mrf.mxu1  ;;  %2172 = vmatprep.subr.bf16.mxu1 %v2240_v28 }
 0x109   : > { %v1313_v33 = vmax.f32 %v1297_v2, 0.0  ;;  %v1070_v35 = vadd.f32 %v2117_v31, %v859_v29  ;;  %v1277_v39 = vadd.f32 %v1238_v5, %v1067_v4  ;;  %v1327_v43 = vpack.c.bf16 %v1315_v30, %v1314_v38  ;;  %2173 = vmatpush3.bf16.msra.mxu1 %v2240_v28  ;;  %v1963_v2 = vld [vmem:[%s2684_s10] ss:$0 sm:$0xff] }
 0x10a   : > { %v1031_v40 = vpop.f32.mrf.mxu0  ;;  %v1241_v7 = vpop.f32.mrf.mxu1  ;;  %v1302_v52 = vadd.f32 %v2556_v34, %v1279_v42 }
 0x10b   : > { %v1326_v41 = vpack.c.bf16 %v1313_v33, %v1312_v32  ;;  %v1280_v6 = vadd.f32 %v2137_v36, %v1070_v35  ;;  %v1068_v44 = vadd.f32 %v1031_v40, %v851_v37  ;;  %v1300_v8 = vadd.f32 %v2556_v34, %v1277_v39 }
 0x10c   : > { %v2120_v45 = vpop.f32.mrf.mxu0  ;;  %v2140_v49 = vpop.f32.mrf.mxu1  ;;  %v1318_v18 = vmax.f32 %v1302_v52, 0.0 }
 0x10d   : > { %v1303_v48 = vadd.f32 %v2556_v34, %v1280_v6  ;;  %2154 = vmatprep.mubr.msk.bf16.mxu0 %vm1371_vm4, %v1326_v41  ;;  %v1278_v9 = vadd.f32 %v1241_v7, %v1068_v44  ;;  %v1073_v10 = vadd.f32 %v2120_v45, %v872_v46  ;;  %v1316_v59 = vmax.f32 %v1300_v8, 0.0 }
 0x10e   : > { %v1044_v50 = vpop.f32.mrf.mxu0  ;;  %2155 = vmatmul.mubr.msk.bf16.gmra.mxu0 %vm1371_vm4, %v1327_v43  ;;  %v1254_v53 = vpop.f32.mrf.mxu1 }
 0x10f   : > { %v1071_v11 = vadd.f32 %v1044_v50, %v864_v47  ;;  %v1301_v12 = vadd.f32 %v2556_v34, %v1278_v9  ;;  %v1319_v55 = vmax.f32 %v1303_v48, 0.0  ;;  %v1283_v14 = vadd.f32 %v2140_v49, %v1073_v10 }
 0x110   : > { %v2121_v13 = vpop.f32.mrf.mxu0  ;;  %v2141_v58 = vpop.f32.mrf.mxu1 }
 0x111   : > { %v1281_v56 = vadd.f32 %v1254_v53, %v1071_v11  ;;  %v1074_v57 = vadd.f32 %v2121_v13, %v875_v51  ;;  %v1317_v60 = vmax.f32 %v1301_v12, 0.0  ;;  %v1329_v22 = vpack.c.bf16 %v1319_v55, %v1318_v18 }
 0x112   : > { %v1047_v61 = vpop.f32.mrf.mxu0  ;;  %v1257_v21 = vpop.f32.mrf.mxu1  ;;  %v1306_v16 = vadd.f32 %v2556_v34, %v1283_v14 }
 0x113   : > { %v1284_v15 = vadd.f32 %v2141_v58, %v1074_v57  ;;  %v1072_v19 = vadd.f32 %v1047_v61, %v867_v54  ;;  %v1328_v20 = vpack.c.bf16 %v1317_v60, %v1316_v59  ;;  %v1304_v23 = vadd.f32 %v2556_v34, %v1281_v56 }
 0x114   : > { %v1322_v25 = vmax.f32 %v1306_v16, 0.0 }
 0x115   : > { %v1307_v24 = vadd.f32 %v2556_v34, %v1284_v15  ;;  %v1282_v62 = vadd.f32 %v1257_v21, %v1072_v19  ;;  %2158 = vmatprep.mubr.msk.bf16.mxu0 %vm1371_vm4, %v1328_v20  ;;  %v1320_v63 = vmax.f32 %v1304_v23, 0.0 }
 0x116   : > { %2159 = vmatmul.mubr.msk.bf16.gmra.mxu0 %vm1371_vm4, %v1329_v22 }
 0x117   : > { %v1305_v17 = vadd.f32 %v2556_v34, %v1282_v62  ;;  %v1323_v0 = vmax.f32 %v1307_v24, 0.0 }
 0x119   : > { %v1321_v1 = vmax.f32 %v1305_v17, 0.0  ;;  %v1331_v27 = vpack.c.bf16 %v1323_v0, %v1322_v25 }
 0x11b   : > { %v1330_v26 = vpack.c.bf16 %v1321_v1, %v1320_v63  ;;  %v2615_v63 = vld [vmem:[%s2686_s12] ss:$0 sm:$0xff] }
 0x11d   : > { %2162 = vmatprep.mubr.msk.bf16.mxu0 %vm1371_vm4, %v1330_v26 }
 0x11e   : > { %2163 = vmatmul.mubr.msk.bf16.gmra.mxu0 %vm1371_vm4, %v1331_v27 }
 0x1c6   : > { %v2152_v29 = vpop.f32.mrf.mxu0 }
 0x1c7   : > { %v1439_v30 = vadd.f32 %v2152_v29, %v1963_v2 }
 0x1c8   : > { %v1430_v34 = vpop.f32.mrf.mxu0 }
 0x1c9   : > { %v1431_v4 = vadd.f32 %v1963_v2, %v1430_v34  ;;  %v1495_v38 = vmax.f32 %v1439_v30, 0.0 }
 0x1ca   : > { %v2153_v3 = vpop.f32.mrf.mxu0 }
 0x1cb   : > { %v1442_v5 = vadd.f32 %v2153_v3, %v1963_v2  ;;  %v1493_v36 = vmax.f32 %v1431_v4, 0.0 }
 0x1cc   : > { %v1433_v31 = vpop.f32.mrf.mxu0 }
 0x1cd   : > { %v1434_v32 = vadd.f32 %v1963_v2, %v1433_v31  ;;  %v1496_v33 = vmax.f32 %v1442_v5, 0.0 }
 0x1ce   : > { %v2156_v35 = vpop.f32.mrf.mxu0 }
 0x1cf   : > { %v1494_v37 = vmax.f32 %v1434_v32, 0.0  ;;  %v1510_v41 = vpack.c.bf16 %v1496_v33, %v1495_v38  ;;  %v1455_v43 = vadd.f32 %v2156_v35, %v1963_v2 }
 0x1d0   : > { %v1446_v39 = vpop.f32.mrf.mxu0 }
 0x1d1   : > { %v1509_v40 = vpack.c.bf16 %v1494_v37, %v1493_v36  ;;  %v1447_v6 = vadd.f32 %v1963_v2, %v1446_v39  ;;  %v1499_v8 = vmax.f32 %v1455_v43, 0.0 }
 0x1d2   : > { %v2157_v42 = vpop.f32.mrf.mxu0 }
 0x1d3   : > { %v1458_v7 = vadd.f32 %v2157_v42, %v1963_v2  ;;  %2174 = vmatprep.mubr.msk.bf16.mxu1 %vm1371_vm4, %v1509_v40  ;;  %v1497_v47 = vmax.f32 %v1447_v6, 0.0 }
 0x1d4   : > { %v1449_v44 = vpop.f32.mrf.mxu0  ;;  %2175 = vmatmul.mubr.msk.bf16.vlgmr.msra.gmra.mxu1 %vm1371_vm4, %v1510_v41 }
 0x1d5   : > { %v1450_v45 = vadd.f32 %v1963_v2, %v1449_v44  ;;  %v1500_v46 = vmax.f32 %v1458_v7, 0.0 }
 0x1d6   : > { %v2160_v49 = vpop.f32.mrf.mxu0 }
 0x1d7   : > { %v1498_v48 = vmax.f32 %v1450_v45, 0.0  ;;  %v1512_v51 = vpack.c.bf16 %v1500_v46, %v1499_v8  ;;  %v1471_v53 = vadd.f32 %v2160_v49, %v1963_v2 }
 0x1d8   : > { %v1462_v50 = vpop.f32.mrf.mxu0 }
 0x1d9   : > { %v1511_v9 = vpack.c.bf16 %v1498_v48, %v1497_v47  ;;  %v1463_v10 = vadd.f32 %v1963_v2, %v1462_v50  ;;  %v1503_v58 = vmax.f32 %v1471_v53, 0.0 }
 0x1da   : > { %v2161_v52 = vpop.f32.mrf.mxu0 }
 0x1db   : > { %2178 = vmatprep.mubr.msk.bf16.mxu1 %vm1371_vm4, %v1511_v9  ;;  %v1474_v11 = vadd.f32 %v2161_v52, %v1963_v2  ;;  %v1501_v56 = vmax.f32 %v1463_v10, 0.0 }
 0x1dc   : > { %2179 = vmatmul.mubr.msk.bf16.gmra.mxu1 %vm1371_vm4, %v1512_v51  ;;  %v1465_v12 = vpop.f32.mrf.mxu0 }
 0x1dd   : > { %v1466_v13 = vadd.f32 %v1963_v2, %v1465_v12  ;;  %v1504_v54 = vmax.f32 %v1474_v11, 0.0 }
 0x1de   : > { %v2164_v55 = vpop.f32.mrf.mxu0 }
 0x1df   : > { %v1502_v57 = vmax.f32 %v1466_v13, 0.0  ;;  %v1514_v61 = vpack.c.bf16 %v1504_v54, %v1503_v58  ;;  %v1487_v19 = vadd.f32 %v2164_v55, %v1963_v2 }
 0x1e0   : > { %v1478_v59 = vpop.f32.mrf.mxu0 }
 0x1e1   : > { %v1513_v60 = vpack.c.bf16 %v1502_v57, %v1501_v56  ;;  %v1479_v14 = vadd.f32 %v1963_v2, %v1478_v59  ;;  %v1507_v62 = vmax.f32 %v1487_v19, 0.0 }
 0x1e2   : > { %v2165_v18 = vpop.f32.mrf.mxu0 }
 0x1e3   : > { %v1490_v15 = vadd.f32 %v2165_v18, %v1963_v2  ;;  %2182 = vmatprep.mubr.msk.bf16.mxu1 %vm1371_vm4, %v1513_v60  ;;  %v1505_v23 = vmax.f32 %v1479_v14, 0.0 }
 0x1e4   : > { %v1481_v20 = vpop.f32.mrf.mxu0  ;;  %2183 = vmatmul.mubr.msk.bf16.gmra.mxu1 %vm1371_vm4, %v1514_v61 }
 0x1e5   : > { %v1482_v21 = vadd.f32 %v1963_v2, %v1481_v20  ;;  %v1508_v22 = vmax.f32 %v1490_v15, 0.0 }
 0x1e7   : > { %v1506_v24 = vmax.f32 %v1482_v21, 0.0  ;;  %v1516_v17 = vpack.c.bf16 %v1508_v22, %v1507_v62 }
 0x1e9   : > { %v1515_v16 = vpack.c.bf16 %v1506_v24, %v1505_v23 }
 0x1eb   : > { %2186 = vmatprep.mubr.msk.bf16.mxu1 %vm1371_vm4, %v1515_v16 }
 0x1ec   : > { %2187 = vmatmul.mubr.msk.bf16.gmra.mxu1 %vm1371_vm4, %v1516_v17 }
 0x294   : > { %v2176_v0 = vpop.f32.mrf.mxu1 }
 0x295   : > { %v1623_v1 = vadd.f32 %v2176_v0, %v2615_v63 }
 0x296   : > { %v1614_v25 = vpop.f32.mrf.mxu1 }
 0x297   : > { %v1991_v26 = vmul.f32 -1.442695, %v1623_v1  ;;  %v1615_v27 = vadd.f32 %v2615_v63, %v1614_v25 }
 0x298   : > { %v2177_v28 = vpop.f32.mrf.mxu1 }
 0x299   : > { %2241 = vpow2.f32 %v1991_v26  ;;  %v1989_v29 = vmul.f32 -1.442695, %v1615_v27  ;;  %v1626_v34 = vadd.f32 %v2177_v28, %v2615_v63 }
 0x29a   : > { %v1617_v2 = vpop.f32.mrf.mxu1 }
 0x29b   : > { %2243 = vpow2.f32 %v1989_v29  ;;  %v1992_v3 = vmul.f32 -1.442695, %v1626_v34  ;;  %v1618_v4 = vadd.f32 %v2615_v63, %v1617_v2 }
 0x29c   : > { %v2180_v5 = vpop.f32.mrf.mxu1 }
 0x29d   : > { %2245 = vpow2.f32 %v1992_v3  ;;  %v1990_v30 = vmul.f32 -1.442695, %v1618_v4  ;;  %v1639_v31 = vadd.f32 %v2180_v5, %v2615_v63 }
 0x29e   : > { %v1630_v32 = vpop.f32.mrf.mxu1 }
 0x29f   : > { %2247 = vpow2.f32 %v1990_v30  ;;  %v1995_v33 = vmul.f32 -1.442695, %v1639_v31  ;;  %v1631_v35 = vadd.f32 %v2615_v63, %v1630_v32 }
 0x2a0   : > { %v2181_v36 = vpop.f32.mrf.mxu1 }
 0x2a1   : > { %2249 = vpow2.f32 %v1995_v33  ;;  %v1993_v37 = vmul.f32 -1.442695, %v1631_v35  ;;  %v1642_v38 = vadd.f32 %v2181_v36, %v2615_v63 }
 0x2a2   : > { %v1633_v39 = vpop.f32.mrf.mxu1 }
 0x2a3   : > { %2251 = vpow2.f32 %v1993_v37  ;;  %v1996_v40 = vmul.f32 -1.442695, %v1642_v38  ;;  %v1634_v41 = vadd.f32 %v2615_v63, %v1633_v39 }
 0x2a4   : > { %v2184_v6 = vpop.f32.mrf.mxu1 }
 0x2a5   : > { %2253 = vpow2.f32 %v1996_v40  ;;  %v1994_v42 = vmul.f32 -1.442695, %v1634_v41  ;;  %v1655_v43 = vadd.f32 %v2184_v6, %v2615_v63 }
 0x2a6   : > { %v2242_v7 = vpop.eup %2241  ;;  %v1646_v45 = vpop.f32.mrf.mxu1 }
 0x2a7   : > { %v1727_v44 = vadd.f32 1.0, %v2242_v7  ;;  %2255 = vpow2.f32 %v1994_v42  ;;  %v1999_v47 = vmul.f32 -1.442695, %v1655_v43  ;;  %v1647_v48 = vadd.f32 %v2615_v63, %v1646_v45 }
 0x2a8   : > { %v2244_v46 = vpop.eup %2243  ;;  %v2185_v8 = vpop.f32.mrf.mxu1 }
 0x2a9   : > { %2257 = vrcp.f32 %v1727_v44  ;;  %v1725_v49 = vadd.f32 1.0, %v2244_v46  ;;  %v1997_v50 = vmul.f32 -1.442695, %v1647_v48  ;;  %v1658_v51 = vadd.f32 %v2185_v8, %v2615_v63 }
 0x2aa   : > { %v2246_v9 = vpop.eup %2245  ;;  %2259 = vpow2.f32 %v1999_v47  ;;  %v1649_v10 = vpop.f32.mrf.mxu1 }
 0x2ab   : > { %2261 = vrcp.f32 %v1725_v49  ;;  %v1728_v52 = vadd.f32 1.0, %v2246_v9  ;;  %v2000_v53 = vmul.f32 -1.442695, %v1658_v51  ;;  %v1650_v12 = vadd.f32 %v2615_v63, %v1649_v10 }
 0x2ac   : > { %v2248_v11 = vpop.eup %2247  ;;  %2263 = vpow2.f32 %v1997_v50  ;;  %v2188_v54 = vpop.f32.mrf.mxu1 }
 0x2ad   : > { %2265 = vrcp.f32 %v1728_v52  ;;  %v1726_v13 = vadd.f32 1.0, %v2248_v11  ;;  %v1998_v56 = vmul.f32 -1.442695, %v1650_v12  ;;  %v1671_v57 = vadd.f32 %v2188_v54, %v2615_v63 }
 0x2ae   : > { %v2250_v55 = vpop.eup %2249  ;;  %2267 = vpow2.f32 %v2000_v53  ;;  %v1662_v59 = vpop.f32.mrf.mxu1 }
 0x2af   : > { %2269 = vrcp.f32 %v1726_v13  ;;  %v1731_v58 = vadd.f32 1.0, %v2250_v55  ;;  %v2003_v61 = vmul.f32 -1.442695, %v1671_v57  ;;  %v1663_v18 = vadd.f32 %v2615_v63, %v1662_v59 }
 0x2b0   : > { %v2252_v60 = vpop.eup %2251  ;;  %2271 = vpow2.f32 %v1998_v56  ;;  %v2189_v15 = vpop.f32.mrf.mxu1 }
 0x2b1   : > { %2273 = vrcp.f32 %v1731_v58  ;;  %v1729_v14 = vadd.f32 1.0, %v2252_v60  ;;  %v2001_v20 = vmul.f32 -1.442695, %v1663_v18  ;;  %v1674_v21 = vadd.f32 %v2189_v15, %v2615_v63 }
 0x2b2   : > { %v2254_v19 = vpop.eup %2253  ;;  %2275 = vpow2.f32 %v2003_v61  ;;  %v1665_v23 = vpop.f32.mrf.mxu1 }
 0x2b3   : > { %2277 = vrcp.f32 %v1729_v14  ;;  %v1732_v22 = vadd.f32 1.0, %v2254_v19  ;;  %v2004_v62 = vmul.f32 -1.442695, %v1674_v21  ;;  %v1666_v16 = vadd.f32 %v2615_v63, %v1665_v23 }
 0x2b4   : > { %v2256_v24 = vpop.eup %2255  ;;  %2279 = vpow2.f32 %v2001_v20 }
 0x2b5   : > { %2281 = vrcp.f32 %v1732_v22  ;;  %v1730_v17 = vadd.f32 1.0, %v2256_v24  ;;  %v2002_v1 = vmul.f32 -1.442695, %v1666_v16 }
 0x2b6   : > { %v2258_v0 = vpop.eup %2257  ;;  %2283 = vpow2.f32 %v2004_v62 }
 0x2b7   : > { %v2260_v25 = vpop.eup %2259  ;;  %1775 = vst.msk [vmem:[%s2636_s14 + $0x10] sm:$0xff] %vm585_vm2, %v2258_v0  ;;  %2285 = vrcp.f32 %v1730_v17 }
 0x2b8   : > { %v2262_v26 = vpop.eup %2261  ;;  %v1735_v27 = vadd.f32 1.0, %v2260_v25  ;;  %2287 = vpow2.f32 %v2002_v1 }
 0x2b9   : > { %v2264_v28 = vpop.eup %2263  ;;  %1773 = vst.msk [vmem:[%s2636_s14] sm:$0xff] %vm585_vm2, %v2262_v26 }
 0x2ba   : > { %v2266_v29 = vpop.eup %2265  ;;  %2289 = vrcp.f32 %v1735_v27  ;;  %v1733_v63 = vadd.f32 1.0, %v2264_v28 }
 0x2bb   : > { %v2268_v34 = vpop.eup %2267  ;;  %1776 = vst.msk [vmem:[%s2636_s14 + $0x18] sm:$0xff] %vm585_vm2, %v2266_v29 }
 0x2bc   : > { %v2270_v2 = vpop.eup %2269  ;;  %2291 = vrcp.f32 %v1733_v63  ;;  %v1736_v3 = vadd.f32 1.0, %v2268_v34 }
 0x2bd   : > { %v2272_v4 = vpop.eup %2271  ;;  %1774 = vst.msk [vmem:[%s2636_s14 + $0x8] sm:$0xff] %vm585_vm2, %v2270_v2 }
 0x2be   : > { %v2274_v5 = vpop.eup %2273  ;;  %2293 = vrcp.f32 %v1736_v3  ;;  %v1734_v30 = vadd.f32 1.0, %v2272_v4 }
 0x2bf   : > { %v2276_v31 = vpop.eup %2275  ;;  %1779 = vst.msk [vmem:[%s2636_s14 + $0x30] sm:$0xff] %vm585_vm2, %v2274_v5 }
 0x2c0   : > { %v2278_v32 = vpop.eup %2277  ;;  %2295 = vrcp.f32 %v1734_v30  ;;  %v1739_v33 = vadd.f32 1.0, %v2276_v31 }
 0x2c1   : > { %v2280_v35 = vpop.eup %2279  ;;  %1777 = vst.msk [vmem:[%s2636_s14 + $0x20] sm:$0xff] %vm585_vm2, %v2278_v32 }
 0x2c2   : > { %v2282_v36 = vpop.eup %2281  ;;  %2297 = vrcp.f32 %v1739_v33  ;;  %v1737_v37 = vadd.f32 1.0, %v2280_v35 }
 0x2c3   : > { %v2284_v38 = vpop.eup %2283  ;;  %1780 = vst.msk [vmem:[%s2636_s14 + $0x38] sm:$0xff] %vm585_vm2, %v2282_v36 }
 0x2c4   : > { %v2286_v39 = vpop.eup %2285  ;;  %2299 = vrcp.f32 %v1737_v37  ;;  %v1740_v40 = vadd.f32 1.0, %v2284_v38 }
 0x2c5   : > { %v2288_v41 = vpop.eup %2287  ;;  %1778 = vst.msk [vmem:[%s2636_s14 + $0x28] sm:$0xff] %vm585_vm2, %v2286_v39 }
 0x2c6   : > { %2301 = vrcp.f32 %v1740_v40  ;;  %v1738_v42 = vadd.f32 1.0, %v2288_v41 }
 0x2c7   : > { %v2290_v6 = vpop.eup %2289 }
 0x2c8   : > { %1783 = vst.msk [vmem:[%s2636_s14 + $0x50] sm:$0xff] %vm585_vm2, %v2290_v6  ;;  %2303 = vrcp.f32 %v1738_v42 }
 0x2c9   : > { %v2292_v7 = vpop.eup %2291 }
 0x2ca   : > { %1781 = vst.msk [vmem:[%s2636_s14 + $0x40] sm:$0xff] %vm585_vm2, %v2292_v7 }
 0x2cb   : > { %v2294_v43 = vpop.eup %2293 }
 0x2cc   : > { %1784 = vst.msk [vmem:[%s2636_s14 + $0x58] sm:$0xff] %vm585_vm2, %v2294_v43 }
 0x2cd   : > { %v2296_v44 = vpop.eup %2295 }
 0x2ce   : > { %1782 = vst.msk [vmem:[%s2636_s14 + $0x48] sm:$0xff] %vm585_vm2, %v2296_v44 }
 0x2cf   : > { %v2298_v45 = vpop.eup %2297 }
 0x2d0   : > { %1787 = vst.msk [vmem:[%s2636_s14 + $0x70] sm:$0xff] %vm585_vm2, %v2298_v45 }
 0x2d1   : > { %v2300_v46 = vpop.eup %2299 }
 0x2d2   : > { %1785 = vst.msk [vmem:[%s2636_s14 + $0x60] sm:$0xff] %vm585_vm2, %v2300_v46 }
 0x2d3   : > { %v2302_v47 = vpop.eup %2301 }
 0x2d4   : > { %1788 = vst.msk [vmem:[%s2636_s14 + $0x78] sm:$0xff] %vm585_vm2, %v2302_v47 }
 0x2d5   : > { %v2304_v48 = vpop.eup %2303 }
 0x2d6   : > { %1786 = vst.msk [vmem:[%s2636_s14 + $0x68] sm:$0xff] %vm585_vm2, %v2304_v48 }
 0x2d7 PF: > { %s23_s25 = sadd.s32 1, %s2311_s25  }
 0x2d8   : > { %p20_p4 = scmp.ge.s32.totalorder %s23_s25, 4  }
 0x2da   :  { %22 = sbr.rel (!%p20_p4) target bundleno = 1 (0x1), region = 111 }

</bundles_post_ra>
